<compile_context>
chip_gen: v5e
topology: v5e:2x2
jax: 0.10.0
libtpu: 0.0.40
codegen_flags: <defaults>
</compile_context>

<pallas_src>
import jax
import jax.numpy as jnp
from jax import lax
from jax.experimental import pallas as pl
from jax.experimental.pallas import tpu as pltpu


def _round_up(x, m):
    return ((x + m - 1) // m) * m


# ---------------------------------------------------------------------------
# Kernel: one batch tile per grid step, fused twin-head MLP.
#   x_ref  : (TB,  Din) bf16  batch-major rows = [state ; action ; 1 ; 0-pad]
#   w1t_ref: (H2p, Din) bf16  fused layer-1 (bias folded via the ones column)
#   w2t_ref: (H2p, H2p) bf16  block-diagonal layer-2 (+ bias via const channel)
#   w3t_ref: (8,   H2p) bf16  fused layer-3 (+ bias via const channel), rows 2-7 zero
#   out_ref: (8,   TB)  f32   row 0 = q1, row 1 = q2  (batch on lanes -> dense vst)
# ---------------------------------------------------------------------------
def qnetwork_kernel(x_ref, w1t_ref, w2t_ref, w3t_ref, out_ref):
    # Layer 1: contract Din (minor dim of both operands) -> feature-major (H2p, TB).
    h = lax.dot_general(
        w1t_ref[...], x_ref[...],
        dimension_numbers=(((1,), (1,)), ((), ())),
        preferred_element_type=jnp.float32)
    h = jnp.maximum(h, 0.0).astype(jnp.bfloat16)

    # Layer 2 (block-diagonal, both heads at once).
    h = jnp.dot(w2t_ref[...], h, preferred_element_type=jnp.float32)
    h = jnp.maximum(h, 0.0).astype(jnp.bfloat16)

    # Layer 3: (8, H2p) @ (H2p, TB) -> (8, TB).
    q = jnp.dot(w3t_ref[...], h, preferred_element_type=jnp.float32)
    out_ref[...] = q.astype(out_ref.dtype)


# ---------------------------------------------------------------------------
# Parameter init (matches torch: xavier_uniform weights, zero biases).
# Weights are stored (in_features, out_features) so y = x @ W + b.
# ---------------------------------------------------------------------------
def xavier_uniform(key, fan_in, fan_out, dtype=jnp.float32):
    limit = (6.0 / (fan_in + fan_out)) ** 0.5
    return jax.random.uniform(key, (fan_in, fan_out), dtype, minval=-limit, maxval=limit)


def init_qnetwork_params(key, state_dim, action_dim, hidden_dim):
    D = state_dim + action_dim
    k = jax.random.split(key, 6)
    return {
        "w1a": xavier_uniform(k[0], D, hidden_dim), "b1a": jnp.zeros((hidden_dim,), jnp.float32),
        "w2a": xavier_uniform(k[1], hidden_dim, hidden_dim), "b2a": jnp.zeros((hidden_dim,), jnp.float32),
        "w3a": xavier_uniform(k[2], hidden_dim, 1), "b3a": jnp.zeros((1,), jnp.float32),
        "w1b": xavier_uniform(k[3], D, hidden_dim), "b1b": jnp.zeros((hidden_dim,), jnp.float32),
        "w2b": xavier_uniform(k[4], hidden_dim, hidden_dim), "b2b": jnp.zeros((hidden_dim,), jnp.float32),
        "w3b": xavier_uniform(k[5], hidden_dim, 1), "b3b": jnp.zeros((1,), jnp.float32),
    }


# ---------------------------------------------------------------------------
# One-time packing: fuse heads, fold biases, pad, transpose, cast to bf16.
# ---------------------------------------------------------------------------
def pack_qnetwork_params(params, state_dim, action_dim, hidden_dim):
    H = hidden_dim
    D = state_dim + action_dim
    Din = _round_up(D + 1, 8)          # +1 ones column for folded layer-1 bias
    H2 = 2 * H
    Hc = H2                            # constant-1 hidden channel (carries b2/b3)
    H2p = _round_up(H2 + 1, 16)        # bf16 sublane-aligned fused hidden width
    NOUT = 8                           # q rows padded to a native 8-sublane f32 tile

    w1 = jnp.zeros((Din, H2p), jnp.float32)
    w1 = w1.at[:D, 0:H].set(params["w1a"])
    w1 = w1.at[:D, H:H2].set(params["w1b"])
    w1 = w1.at[D, 0:H].set(params["b1a"])
    w1 = w1.at[D, H:H2].set(params["b1b"])
    w1 = w1.at[D, Hc].set(1.0)                       # keep the constant channel alive

    w2 = jnp.zeros((H2p, H2p), jnp.float32)          # block-diagonal (heads don't mix)
    w2 = w2.at[0:H, 0:H].set(params["w2a"])
    w2 = w2.at[H:H2, H:H2].set(params["w2b"])
    w2 = w2.at[Hc, 0:H].set(params["b2a"])
    w2 = w2.at[Hc, H:H2].set(params["b2b"])
    w2 = w2.at[Hc, Hc].set(1.0)

    w3 = jnp.zeros((H2p, NOUT), jnp.float32)         # cols 2..7 stay zero
    w3 = w3.at[0:H, 0].set(params["w3a"][:, 0])
    w3 = w3.at[H:H2, 1].set(params["w3b"][:, 0])
    w3 = w3.at[Hc, 0].set(params["b3a"][0])
    w3 = w3.at[Hc, 1].set(params["b3b"][0])

    return {
        "w1t": w1.T.astype(jnp.bfloat16),            # (H2p, Din)
        "w2t": w2.T.astype(jnp.bfloat16),            # (H2p, H2p)
        "w3t": w3.T.astype(jnp.bfloat16),            # (NOUT, H2p)
        "dims": (state_dim, action_dim, hidden_dim, D, Din, H2p, NOUT),
    }


# ---------------------------------------------------------------------------
# Forward wrapper: batch-major bf16 input (no transpose), gridded pallas_call.
# ---------------------------------------------------------------------------
def qnetwork_forward(packed, state, action):
    w1t, w2t, w3t = packed["w1t"], packed["w2t"], packed["w3t"]
    state_dim, action_dim, _, D, Din, H2p, NOUT = packed["dims"]
    B = state.shape[0]

    # Batch tile: lane-aligned, large (per-step overhead bound), VMEM-safe on v7x.
    TB = min(2048, _round_up(max(B, 1), 128))
    # v7x megacore: prefer >= 2 grid steps when the batch is large enough to split.
    if B >= 256 and _round_up(B, TB) // TB < 2:
        TB = _round_up((B + 1) // 2, 128)
    B_pad = _round_up(B, TB)
    grid = (B_pad // TB,)

    # Batch-major bf16 input: [state ; action ; 1 ; zero-pad] per row.
    # No wrapper-side transpose; half the HBM bytes of the old f32 slab.
    x = jnp.zeros((B_pad, Din), jnp.bfloat16)
    x = x.at[:B, :state_dim].set(state.astype(jnp.bfloat16))
    x = x.at[:B, state_dim:D].set(action.astype(jnp.bfloat16))
    x = x.at[:B, D].set(1.0)

    flops = 2 * B_pad * (Din * H2p + H2p * H2p + H2p * NOUT)
    bytes_accessed = (
        x.size * 2 + NOUT * B_pad * 4 + (w1t.size + w2t.size + w3t.size) * 2
    )

    out = pl.pallas_call(
        qnetwork_kernel,
        out_shape=jax.ShapeDtypeStruct((NOUT, B_pad), jnp.float32),
        grid=grid,
        in_specs=[
            pl.BlockSpec((TB, Din), lambda i: (i, 0)),      # x tile: pipelined over batch
            pl.BlockSpec((H2p, Din), lambda i: (0, 0)),     # weights: resident in VMEM
            pl.BlockSpec((H2p, H2p), lambda i: (0, 0)),
            pl.BlockSpec((NOUT, H2p), lambda i: (0, 0)),
        ],
        out_specs=pl.BlockSpec((NOUT, TB), lambda i: (0, i)),  # lane-dense (batch on lanes)
        compiler_params=pltpu.CompilerParams(
            dimension_semantics=("parallel",),              # megacore sharding
        ),
        cost_estimate=pl.CostEstimate(
            flops=flops, transcendentals=0, bytes_accessed=bytes_accessed
        ),
    )(x, w1t, w2t, w3t)

    q1 = out[0, :B][:, None]
    q2 = out[1, :B][:, None]
    return q1, q2


# ---------------------------------------------------------------------------
# Pure-JAX f32 reference (mirrors the PyTorch module exactly).
# ---------------------------------------------------------------------------
def qnetwork_ref(params, state, action):
    x = jnp.concatenate([state, action], axis=1).astype(jnp.float32)
    h = jnp.maximum(x @ params["w1a"] + params["b1a"], 0.0)
    h = jnp.maximum(h @ params["w2a"] + params["b2a"], 0.0)
    q1 = h @ params["w3a"] + params["b3a"]
    g = jnp.maximum(x @ params["w1b"] + params["b1b"], 0.0)
    g = jnp.maximum(g @ params["w2b"] + params["b2b"], 0.0)
    q2 = g @ params["w3b"] + params["b3b"]
    return q1, q2


if __name__ == "__main__":
    state_dim, action_dim, hidden_dim = 8, 4, 32
    batch = 2

    key = jax.random.PRNGKey(0)
    k_params, k_state, k_action = jax.random.split(key, 3)

    params = init_qnetwork_params(k_params, state_dim, action_dim, hidden_dim)
    packed = pack_qnetwork_params(params, state_dim, action_dim, hidden_dim)

    state = jax.random.normal(k_state, (batch, state_dim), jnp.float32)
    action = jax.random.normal(k_action, (batch, action_dim), jnp.float32)

    q1, q2 = qnetwork_forward(packed, state, action)
    q1 = jax.block_until_ready(q1)
    q2 = jax.block_until_ready(q2)

    r1, r2 = qnetwork_ref(params, state, action)
    assert q1.shape == (batch, 1) and q2.shape == (batch, 1)
    # bf16 weights/activations (f32 accumulate) -> slightly loose tolerance.
    assert jnp.allclose(q1, r1, atol=5e-2, rtol=5e-2), (q1, r1)
    assert jnp.allclose(q2, r2, atol=5e-2, rtol=5e-2), (q2, r2)

    print("KERNEL_OK")
</pallas_src>

<mosaic_0001>
module attributes {stable_mosaic.version = 11 : i64} {
  func.func @qnetwork_kernel(%arg0: i32, %arg1: memref<128x16xbf16, #tpu.memory_space<vmem>>, %arg2: memref<80x16xbf16, #tpu.memory_space<vmem>>, %arg3: memref<80x80xbf16, #tpu.memory_space<vmem>>, %arg4: memref<8x80xbf16, #tpu.memory_space<vmem>>, %arg5: memref<8x128xf32, #tpu.memory_space<vmem>>) attributes {dimension_semantics = [#tpu.dimension_semantics<parallel>], iteration_bounds = array<i64: 1>, scalar_prefetch = 0 : i64, scratch_operands = 0 : i64, tpu.core_type = #tpu.core_type<tc>, window_params = [{transform_indices = @transform_0, window_bounds = array<i64: 128, 16>}, {pipeline_mode = #tpu.pipeline_mode<synchronous>, transform_indices = @transform_1, window_bounds = array<i64: 80, 16>}, {pipeline_mode = #tpu.pipeline_mode<synchronous>, transform_indices = @transform_2, window_bounds = array<i64: 80, 80>}, {pipeline_mode = #tpu.pipeline_mode<synchronous>, transform_indices = @transform_3, window_bounds = array<i64: 8, 80>}, {transform_indices = @transform_4, window_bounds = array<i64: 8, 128>}]} {
    %c0 = arith.constant 0 : index
    %c0_0 = arith.constant 0 : index
    %0 = vector.load %arg2[%c0, %c0_0] : memref<80x16xbf16, #tpu.memory_space<vmem>>, vector<80x16xbf16>
    %c0_1 = arith.constant 0 : index
    %c0_2 = arith.constant 0 : index
    %1 = vector.load %arg1[%c0_1, %c0_2] : memref<128x16xbf16, #tpu.memory_space<vmem>>, vector<128x16xbf16>
    %cst = arith.constant dense<0.000000e+00> : vector<80x128xf32>
    %2 = tpu.matmul %0, %1, %cst {dimension_numbers = #tpu.dot_dimension_numbers<[1], [1], [0], [0], [0, 0, 1, 0], [], []>} : vector<80x16xbf16>, vector<128x16xbf16>, vector<80x128xf32> -> vector<80x128xf32>
    %cst_3 = arith.constant 0.000000e+00 : f32
    %3 = vector.broadcast %cst_3 : f32 to vector<80x128xf32>
    %4 = arith.maximumf %2, %3 : vector<80x128xf32>
    %5 = arith.truncf %4 : vector<80x128xf32> to vector<80x128xbf16>
    %c0_4 = arith.constant 0 : index
    %c0_5 = arith.constant 0 : index
    %6 = vector.load %arg3[%c0_4, %c0_5] : memref<80x80xbf16, #tpu.memory_space<vmem>>, vector<80x80xbf16>
    %cst_6 = arith.constant dense<0.000000e+00> : vector<80x128xf32>
    %7 = tpu.matmul %6, %5, %cst_6 {dimension_numbers = #tpu.dot_dimension_numbers<[1], [0], [0], [1], [0, 0, 1, 1], [], []>} : vector<80x80xbf16>, vector<80x128xbf16>, vector<80x128xf32> -> vector<80x128xf32>
    %cst_7 = arith.constant 0.000000e+00 : f32
    %8 = vector.broadcast %cst_7 : f32 to vector<80x128xf32>
    %9 = arith.maximumf %7, %8 : vector<80x128xf32>
    %10 = arith.truncf %9 : vector<80x128xf32> to vector<80x128xbf16>
    %c0_8 = arith.constant 0 : index
    %c0_9 = arith.constant 0 : index
    %11 = vector.load %arg4[%c0_8, %c0_9] : memref<8x80xbf16, #tpu.memory_space<vmem>>, vector<8x80xbf16>
    %cst_10 = arith.constant dense<0.000000e+00> : vector<8x128xf32>
    %12 = tpu.matmul %11, %10, %cst_10 {dimension_numbers = #tpu.dot_dimension_numbers<[1], [0], [0], [1], [0, 0, 1, 1], [], []>} : vector<8x80xbf16>, vector<80x128xbf16>, vector<8x128xf32> -> vector<8x128xf32>
    %c0_11 = arith.constant 0 : index
    %c0_12 = arith.constant 0 : index
    %13 = vector.load %arg5[%c0_11, %c0_12] : memref<8x128xf32, #tpu.memory_space<vmem>>, vector<8x128xf32>
    tpu.vector_store %arg5[%c0_11, %c0_12], %12 {strides = array<i32>} : memref<8x128xf32, #tpu.memory_space<vmem>>, vector<8x128xf32>,
    return
  }
  func.func @transform_0(%arg0: i32) -> (i32, i32) {
    %c0_i32 = arith.constant 0 : i32
    %c0_i32_0 = arith.constant 0 : i32
    return %arg0, %c0_i32 : i32, i32
  }
  func.func @transform_1(%arg0: i32) -> (i32, i32) {
    %c0_i32 = arith.constant 0 : i32
    %c0_i32_0 = arith.constant 0 : i32
    %c0_i32_1 = arith.constant 0 : i32
    return %c0_i32, %c0_i32_0 : i32, i32
  }
  func.func @transform_2(%arg0: i32) -> (i32, i32) {
    %c0_i32 = arith.constant 0 : i32
    %c0_i32_0 = arith.constant 0 : i32
    %c0_i32_1 = arith.constant 0 : i32
    return %c0_i32, %c0_i32_0 : i32, i32
  }
  func.func @transform_3(%arg0: i32) -> (i32, i32) {
    %c0_i32 = arith.constant 0 : i32
    %c0_i32_0 = arith.constant 0 : i32
    %c0_i32_1 = arith.constant 0 : i32
    return %c0_i32, %c0_i32_0 : i32, i32
  }
  func.func @transform_4(%arg0: i32) -> (i32, i32) {
    %c0_i32 = arith.constant 0 : i32
    %c0_i32_0 = arith.constant 0 : i32
    return %c0_i32, %arg0 : i32, i32
  }
}

</mosaic_0001>

<bundles_post_ra>
// kernel: tpu_custom_call.1
= control target key start
LH: loop header
LB: loop body
LE: loop exit
PB: predicated region body
PF: predicated region fallthrough
CT: control target
= control target key end

     0   :  { %vm110_vm0 = vcmask 130048   ;;  %s574_s0 = inlined_call_operand.vmem [shape: bf16[128,16], index: 0, kind: input, shape index: {}]   ;;  %s575_s1 = inlined_call_operand.vmem [shape: bf16[80,16], index: 1, kind: input, shape index: {}]   ;;  %s576_s2 = inlined_call_operand.vmem [shape: bf16[80,80], index: 2, kind: input, shape index: {}]   ;;  %s577_s3 = inlined_call_operand.vmem [shape: bf16[8,80], index: 3, kind: input, shape index: {}]   ;;  %s578_s4 = inlined_call_operand.hbm [shape: f32[8,128], index: 4, kind: output, shape index: {}]  }
   0x1   :  { %v428_v0 = vld [vmem:[%s574_s0 + $0x38] sm:$0xff] }
   0x2   :  { %9 = vsyncpa [#allocation3], 0  ;;  %v148_v1 = vsel %vm110_vm0, %v428_v0, 0  ;;  %v427_v2 = vld [vmem:[%s574_s0 + $0x30] sm:$0xff]  ;;  %v426_v4 = vld [vmem:[%s574_s0 + $0x28] sm:$0xff]  ;;  %vm234_vm1 = vcmask 654336  }
   0x3   :  { %434 = vmatpush.bf16.xpose.msra.mxu3 %v148_v1  ;;  %150 = vmatpush.bf16.xpose.msra.mxu0 %v148_v1  ;;  %v145_v3 = vsel %vm110_vm0, %v427_v2, 0  ;;  %v142_v5 = vsel %vm110_vm0, %v426_v4, 0  ;;  %v425_v6 = vld [vmem:[%s574_s0 + $0x20] sm:$0xff]  ;;  %v424_v8 = vld [vmem:[%s574_s0 + $0x18] sm:$0xff]  ;;  %v423_v10 = vld [vmem:[%s574_s0 + $0x10] sm:$0xff]  ;;  %s469_s24 = smov [#allocation2]  }
   0x4   :  { %v139_v7 = vsel %vm110_vm0, %v425_v6, 0  ;;  %v136_v9 = vsel %vm110_vm0, %v424_v8, 0  ;;  %v133_v11 = vsel %vm110_vm0, %v423_v10, 0  ;;  %v422_v12 = vld [vmem:[%s574_s0 + $0x8] sm:$0xff]  ;;  %v421_v14 = vld [vmem:[%s574_s0] sm:$0xff]  ;;  %v418_v16 = vld [vmem:[%s575_s1 + $0x10] sm:$0xff] }
   0x5   :  { %v130_v13 = vsel %vm110_vm0, %v422_v12, 0  ;;  %v127_v15 = vsel %vm110_vm0, %v421_v14, 0  ;;  %v416_v17 = vld [vmem:[%s575_s1] sm:$0xff]  ;;  %v419_v18 = vld [vmem:[%s575_s1 + $0x18] sm:$0xff]  ;;  %v417_v19 = vld [vmem:[%s575_s1 + $0x8] sm:$0xff]  ;;  %s322_s25 = sshll.u32 %s469_s24, 4  ;;  %s323_s25 = int_to_ptr.vmem [resolvable:$true] %s322_s25 }
   0x6   :  { %v420_v20 = vld [vmem:[%s575_s1 + $0x20] sm:$0xff]  ;;  %v430_v47 = vld [vmem:[%s576_s2 + $0x8] sm:$0xff]  ;;  %v431_v48 = vld [vmem:[%s576_s2 + $0x10] sm:$0xff]  ;;  %s324_s28 = sshll.u32 %s578_s4, 4  ;;  %s325_s28 = int_to_ptr.hbm [resolvable:$true] %s324_s28 }
   0x7   :  { %v429_v46 = vld [vmem:[%s576_s2] sm:$0xff]  ;;  %v432_v49 = vld [vmem:[%s576_s2 + $0x18] sm:$0xff] }
   0x8   :  { %v433_v50 = vld [vmem:[%s576_s2 + $0x20] sm:$0xff] }
   0x9   :  { %v299_v12 = vld [vmem:[%s577_s3] sm:$0xf] }
   0xb   :  { %435 = vmatpush.bf16.xpose.msra.mxu3 %v145_v3  ;;  %151 = vmatpush.bf16.xpose.msra.mxu0 %v145_v3 }
  0x13   :  { %436 = vmatpush.bf16.xpose.msra.mxu3 %v142_v5  ;;  %152 = vmatpush.bf16.xpose.msra.mxu0 %v142_v5 }
  0x1b   :  { %437 = vmatpush.bf16.xpose.msra.mxu3 %v139_v7  ;;  %153 = vmatpush.bf16.xpose.msra.mxu0 %v139_v7 }
  0x23   :  { %438 = vmatpush.bf16.xpose.msra.mxu3 %v136_v9  ;;  %154 = vmatpush.bf16.xpose.msra.mxu0 %v136_v9 }
  0x2b   :  { %439 = vmatpush.bf16.xpose.msra.mxu3 %v133_v11  ;;  %155 = vmatpush.bf16.xpose.msra.mxu0 %v133_v11 }
  0x33   :  { %440 = vmatpush.bf16.xpose.msra.mxu3 %v130_v13  ;;  %156 = vmatpush.bf16.xpose.msra.mxu0 %v130_v13 }
  0x3b   :  { %441 = vmatpush.bf16.xpose.msra.mxu3 %v127_v15  ;;  %157 = vmatpush.bf16.xpose.msra.mxu0 %v127_v15 }
  0x42   :  { %387 = vmatmul.msk.bf16.vlgmr.msra.gmra.mxu3 %vm110_vm0, %v418_v16  ;;  %385 = vmatmul.msk.bf16.vlgmr.msra.gmra.mxu0 %vm110_vm0, %v416_v17 }
  0x52   :  { %388 = vmatmul.msk.bf16.gmra.mxu3 %vm110_vm0, %v419_v18  ;;  %386 = vmatmul.msk.bf16.gmra.mxu0 %vm110_vm0, %v417_v19 }
  0x62   :  { %389 = vmatmul.msk.bf16.gmra.mxu3 %vm110_vm0, %v420_v20 }
  0xbf   :  { %v159_v24 = vpop.f32.mrf.mxu0 }
  0xc0   :  { %v184_v42 = vmax.f32 %v159_v24, 0.0 }
  0xc5   :  { %v169_v21 = vpop.f32.mrf.mxu3 }
  0xc6   :  { %v188_v38 = vmax.f32 %v169_v21, 0.0 }
  0xc7   :  { %v161_v26 = vpop.f32.mrf.mxu0 }
  0xc8   :  { %v185_v43 = vmax.f32 %v161_v26, 0.0 }
  0xca   :  { %v194_v45 = vpack.c.bf16 %v185_v43, %v184_v42 }
  0xcd   :  { %v171_v22 = vpop.f32.mrf.mxu3 }
  0xce   :  { %v189_v35 = vmax.f32 %v171_v22, 0.0 }
  0xcf   :  { %v164_v28 = vpop.f32.mrf.mxu0 }
  0xd0   :  { %v186_v39 = vmax.f32 %v164_v28, 0.0  ;;  %v196_v41 = vpack.c.bf16 %v189_v35, %v188_v38 }
  0xd5   :  { %v174_v23 = vpop.f32.mrf.mxu3 }
  0xd6   :  { %v190_v34 = vmax.f32 %v174_v23, 0.0 }
  0xd7   :  { %v166_v37 = vpop.f32.mrf.mxu0 }
  0xd8   :  { %v187_v40 = vmax.f32 %v166_v37, 0.0 }
  0xda   :  { %v195_v44 = vpack.c.bf16 %v187_v40, %v186_v39 }
  0xdd   :  { %v176_v25 = vpop.f32.mrf.mxu3 }
  0xde   :  { %v191_v32 = vmax.f32 %v176_v25, 0.0 }
  0xe0   :  { %v197_v36 = vpack.c.bf16 %v191_v32, %v190_v34 }
  0xe5   :  { %v179_v27 = vpop.f32.mrf.mxu3 }
  0xe6   :  { %v192_v30 = vmax.f32 %v179_v27, 0.0 }
  0xed   :  { %v181_v29 = vpop.f32.mrf.mxu3 }
  0xee   :  { %v193_v31 = vmax.f32 %v181_v29, 0.0 }
  0xf0   :  { %v198_v33 = vpack.c.bf16 %v193_v31, %v192_v30 }
  0xf2   :  { %253 = vmatpush.bf16.msra.mxu1 %v198_v33 }
  0xf6   :  { %254 = vmatpush.bf16.msra.mxu1 %v197_v36 }
  0xfa   :  { %255 = vmatpush.bf16.msra.mxu1 %v196_v41 }
  0xfe   :  { %256 = vmatpush.bf16.msra.mxu1 %v195_v44 }
 0x102   :  { %257 = vmatpush.bf16.msra.mxu1 %v194_v45 }
 0x105   :  { %410 = vmatmul.msk.bf16.vlgmr.msra.gmra.mxu1 %vm234_vm1, %v429_v46 }
 0x115   :  { %411 = vmatmul.msk.bf16.gmra.mxu1 %vm234_vm1, %v430_v47 }
 0x125   :  { %412 = vmatmul.msk.bf16.gmra.mxu1 %vm234_vm1, %v431_v48 }
 0x135   :  { %413 = vmatmul.msk.bf16.gmra.mxu1 %vm234_vm1, %v432_v49 }
 0x145   :  { %414 = vmatmul.msk.bf16.gmra.mxu1 %vm234_vm1, %v433_v50 }
 0x182   :  { %v259_v51 = vpop.f32.mrf.mxu1 }
 0x183   :  { %v284_v53 = vmax.f32 %v259_v51, 0.0 }
 0x18a   :  { %v261_v52 = vpop.f32.mrf.mxu1 }
 0x18b   :  { %v285_v54 = vmax.f32 %v261_v52, 0.0 }
 0x18d   :  { %v294_v55 = vpack.c.bf16 %v285_v54, %v284_v53 }
 0x192   :  { %v264_v56 = vpop.f32.mrf.mxu1 }
 0x193   :  { %v286_v10 = vmax.f32 %v264_v56, 0.0 }
 0x19a   :  { %v266_v57 = vpop.f32.mrf.mxu1 }
 0x19b   :  { %v287_v8 = vmax.f32 %v266_v57, 0.0 }
 0x19d   :  { %v295_v11 = vpack.c.bf16 %v287_v8, %v286_v10 }
 0x1a2   :  { %v269_v58 = vpop.f32.mrf.mxu1 }
 0x1a3   :  { %v288_v7 = vmax.f32 %v269_v58, 0.0 }
 0x1aa   :  { %v271_v59 = vpop.f32.mrf.mxu1 }
 0x1ab   :  { %v289_v5 = vmax.f32 %v271_v59, 0.0 }
 0x1ad   :  { %v296_v9 = vpack.c.bf16 %v289_v5, %v288_v7 }
 0x1b2   :  { %v274_v60 = vpop.f32.mrf.mxu1 }
 0x1b3   :  { %v290_v4 = vmax.f32 %v274_v60, 0.0 }
 0x1ba   :  { %v276_v61 = vpop.f32.mrf.mxu1 }
 0x1bb   :  { %v291_v2 = vmax.f32 %v276_v61, 0.0 }
 0x1bd   :  { %v297_v6 = vpack.c.bf16 %v291_v2, %v290_v4 }
 0x1c2   :  { %v279_v62 = vpop.f32.mrf.mxu1 }
 0x1c3   :  { %v292_v0 = vmax.f32 %v279_v62, 0.0 }
 0x1ca   :  { %v281_v63 = vpop.f32.mrf.mxu1 }
 0x1cb   :  { %v293_v1 = vmax.f32 %v281_v63, 0.0 }
 0x1cd   :  { %v298_v3 = vpack.c.bf16 %v293_v1, %v292_v0 }
 0x1cf   :  { %306 = vmatpush.bf16.msra.mxu2 %v298_v3 }
 0x1d3   :  { %307 = vmatpush.bf16.msra.mxu2 %v297_v6 }
 0x1d7   :  { %308 = vmatpush.bf16.msra.mxu2 %v296_v9 }
 0x1db   :  { %309 = vmatpush.bf16.msra.mxu2 %v295_v11 }
 0x1df   :  { %310 = vmatpush.bf16.msra.mxu2 %v294_v55 }
 0x1e2   :  { %415 = vmatmul.msk.bf16.vlgmr.msra.gmra.mxu2 %vm234_vm1, %v299_v12 }
 0x265   :  { %v312_v13 = vpop.f32.mrf.mxu2 }
 0x266   :  { %316 = vst [vmem:[#allocation2] sm:$0xff] %v312_v13 }
 0x267   :  { %327 = dma.vmem_to_hbm [thread:$0]  %s323_s25, 128, %s325_s28, [#allocation3]  }
 0x26d   :  { %v314_v14 = vpop.f32.mrf.mxu2 }
 0x26e   :  { %467 = dma.done.wait [#allocation3], 128  }
 0x26f   :  { %468 = vsyncadd [#allocation3], 4294967168 }
 0x270   :  { %332 = vsyncpa [#allocation3], 1 }

</bundles_post_ra>
